<compile_context>
chip_gen: v5e
topology: v5e:2x2
jax: 0.10.0
libtpu: 0.0.40
codegen_flags: <defaults>
</compile_context>

<pallas_src>
import jax
import jax.numpy as jnp
from jax.experimental import pallas as pl
from jax.experimental.pallas import tpu as pltpu


def critic_kernel(x_ref, w1_ref, b1_ref, w2_ref, b2_ref, out_ref):
    # x_ref : (S, TB)   state tile, batch on lanes
    # w1_ref: (H, S)    torch Linear.weight layout (out_features, in_features)
    # b1_ref: (H, 1)
    # w2_ref: (H, 1)    fc2 weight stored as a column
    # b2_ref: (1,)      SMEM scalar
    # out   : (1, TB)   lane-dense value row
    x = x_ref[...]
    w1 = w1_ref[...]
    s_dim = x.shape[0]

    # fc1: (H x S) is <1% of the MXU -> S unrolled VPU FMAs, each an
    # (H,1) x (1,TB) broadcast outer product accumulated into (H,TB).
    h = w1[:, 0:1] * x[0:1, :]
    for s in range(1, s_dim):          # static unroll, S is tiny
        h = h + w1[:, s:s + 1] * x[s:s + 1, :]
    h = jnp.maximum(h + b1_ref[...], 0.0)                  # bias + ReLU (VPU)

    # fc2: weighted sublane reduction (VPU mul + XLU reduce), bias from SMEM.
    v = jnp.sum(h * w2_ref[...], axis=0, keepdims=True)    # (1, TB)
    out_ref[...] = (v + b2_ref[0]).astype(out_ref.dtype)


def critic_forward(state, w1, b1, w2, b2, *, tb=512):
    """state: (B, S) f32; w1: (H, S); b1: (H, 1); w2: (H, 1); b2: (1,). Returns (B, 1)."""
    B, S = state.shape
    H = w1.shape[0]

    # Put batch on the lane axis; pad B up to a lane-aligned tile multiple.
    x = state.T                                   # (S, B)
    lane = 128
    Bp = pl.cdiv(B, lane) * lane
    tb = min(tb, Bp)                              # tb stays a multiple of 128
    nb = pl.cdiv(Bp, tb)
    Bp = nb * tb
    if Bp != B:
        x = jnp.pad(x, ((0, 0), (0, Bp - B)))

    out = pl.pallas_call(
        critic_kernel,
        out_shape=jax.ShapeDtypeStruct((1, Bp), jnp.float32),
        grid=(nb,),
        in_specs=[
            pl.BlockSpec((S, tb), lambda i: (0, i)),   # state: pipelined over batch tiles
            pl.BlockSpec((H, S), lambda i: (0, 0)),    # w1: VMEM-resident across steps
            pl.BlockSpec((H, 1), lambda i: (0, 0)),    # b1: resident
            pl.BlockSpec((H, 1), lambda i: (0, 0)),    # w2: resident
            pl.BlockSpec(memory_space=pltpu.MemorySpace.SMEM),  # b2: scalar path
        ],
        out_specs=pl.BlockSpec((1, tb), lambda i: (0, i)),      # lane-dense output
        compiler_params=pltpu.CompilerParams(
            dimension_semantics=("parallel",),        # dual-TC sharding on v7x
        ),
    )(x, w1, b1, w2, b2)

    return out[0, :B].reshape(B, 1)


def init_params(key, state_dimension, hidden_size=16):
    """Xavier-normal weights (gain=1), zero biases — matches the PyTorch init.

    fc1 weight is kept in torch.nn.Linear layout ((out, in) == (H, S)); fc2's
    weight is stored as an (H, 1) column so the kernel's sublane reduction
    reads it directly.
    """
    k1, k2 = jax.random.split(key)
    std1 = (2.0 / (state_dimension + hidden_size)) ** 0.5
    std2 = (2.0 / (hidden_size + 1)) ** 0.5
    w1 = std1 * jax.random.normal(k1, (hidden_size, state_dimension), jnp.float32)
    b1 = jnp.zeros((hidden_size, 1), jnp.float32)
    w2 = std2 * jax.random.normal(k2, (hidden_size, 1), jnp.float32)
    b2 = jnp.zeros((1,), jnp.float32)
    return w1, b1, w2, b2


if __name__ == "__main__":
    key = jax.random.PRNGKey(0)
    k_state, k_params = jax.random.split(key)

    # Module dims (state_dim=4, hidden=16); batch chosen to exercise the
    # lane-aligned padding + multi-tile grid (1000 -> padded 1024 = 2 x 512).
    batch, state_dim, hidden = 1000, 4, 16
    state = jax.random.normal(k_state, (batch, state_dim), jnp.float32)
    w1, b1, w2, b2 = init_params(k_params, state_dim, hidden)

    value = critic_forward(state, w1, b1, w2, b2)
    value = jax.block_until_ready(value)

    # reference check in plain JAX
    latent = jnp.maximum(state @ w1.T + b1.T, 0.0)
    ref = latent @ w2 + b2
    assert value.shape == (batch, 1)
    assert jnp.allclose(value, ref, atol=1e-5, rtol=1e-5)

    print("KERNEL_OK")
</pallas_src>

<mosaic_0001>
module attributes {stable_mosaic.version = 11 : i64} {
  func.func @critic_kernel(%arg0: i32, %arg1: memref<4x512xf32, #tpu.memory_space<vmem>>, %arg2: memref<16x4xf32, #tpu.memory_space<vmem>>, %arg3: memref<16x1xf32, #tpu.memory_space<vmem>>, %arg4: memref<16x1xf32, #tpu.memory_space<vmem>>, %arg5: memref<1xf32, #tpu.memory_space<smem>>, %arg6: memref<1x512xf32, #tpu.memory_space<vmem>>) attributes {dimension_semantics = [#tpu.dimension_semantics<parallel>], iteration_bounds = array<i64: 2>, scalar_prefetch = 0 : i64, scratch_operands = 0 : i64, tpu.core_type = #tpu.core_type<tc>, window_params = [{transform_indices = @transform_0, window_bounds = array<i64: 4, 512>}, {pipeline_mode = #tpu.pipeline_mode<synchronous>, transform_indices = @transform_1, window_bounds = array<i64: 16, 4>}, {pipeline_mode = #tpu.pipeline_mode<synchronous>, transform_indices = @transform_2, window_bounds = array<i64: 16, 1>}, {pipeline_mode = #tpu.pipeline_mode<synchronous>, transform_indices = @transform_3, window_bounds = array<i64: 16, 1>}, {transform_indices = @transform_4, window_bounds = array<i64: 1>}, {transform_indices = @transform_5, window_bounds = array<i64: 1, 512>}]} {
    %c0 = arith.constant 0 : index
    %c0_0 = arith.constant 0 : index
    %0 = vector.load %arg1[%c0, %c0_0] : memref<4x512xf32, #tpu.memory_space<vmem>>, vector<4x512xf32>
    %c0_1 = arith.constant 0 : index
    %c0_2 = arith.constant 0 : index
    %1 = vector.load %arg2[%c0_1, %c0_2] : memref<16x4xf32, #tpu.memory_space<vmem>>, vector<16x4xf32>
    %2 = vector.extract_strided_slice %1 {offsets = [0, 0], sizes = [16, 1], strides = [1, 1]} : vector<16x4xf32> to vector<16x1xf32>
    %3 = vector.extract_strided_slice %0 {offsets = [0, 0], sizes = [1, 512], strides = [1, 1]} : vector<4x512xf32> to vector<1x512xf32>
    %4 = vector.broadcast %2 : vector<16x1xf32> to vector<16x512xf32>
    %5 = vector.broadcast %3 : vector<1x512xf32> to vector<16x512xf32>
    %6 = arith.mulf %4, %5 : vector<16x512xf32>
    %7 = vector.extract_strided_slice %1 {offsets = [0, 1], sizes = [16, 1], strides = [1, 1]} : vector<16x4xf32> to vector<16x1xf32>
    %8 = vector.extract_strided_slice %0 {offsets = [1, 0], sizes = [1, 512], strides = [1, 1]} : vector<4x512xf32> to vector<1x512xf32>
    %9 = vector.broadcast %7 : vector<16x1xf32> to vector<16x512xf32>
    %10 = vector.broadcast %8 : vector<1x512xf32> to vector<16x512xf32>
    %11 = arith.mulf %9, %10 : vector<16x512xf32>
    %12 = arith.addf %6, %11 : vector<16x512xf32>
    %13 = vector.extract_strided_slice %1 {offsets = [0, 2], sizes = [16, 1], strides = [1, 1]} : vector<16x4xf32> to vector<16x1xf32>
    %14 = vector.extract_strided_slice %0 {offsets = [2, 0], sizes = [1, 512], strides = [1, 1]} : vector<4x512xf32> to vector<1x512xf32>
    %15 = vector.broadcast %13 : vector<16x1xf32> to vector<16x512xf32>
    %16 = vector.broadcast %14 : vector<1x512xf32> to vector<16x512xf32>
    %17 = arith.mulf %15, %16 : vector<16x512xf32>
    %18 = arith.addf %12, %17 : vector<16x512xf32>
    %19 = vector.extract_strided_slice %1 {offsets = [0, 3], sizes = [16, 1], strides = [1, 1]} : vector<16x4xf32> to vector<16x1xf32>
    %20 = vector.extract_strided_slice %0 {offsets = [3, 0], sizes = [1, 512], strides = [1, 1]} : vector<4x512xf32> to vector<1x512xf32>
    %21 = vector.broadcast %19 : vector<16x1xf32> to vector<16x512xf32>
    %22 = vector.broadcast %20 : vector<1x512xf32> to vector<16x512xf32>
    %23 = arith.mulf %21, %22 : vector<16x512xf32>
    %24 = arith.addf %18, %23 : vector<16x512xf32>
    %c0_3 = arith.constant 0 : index
    %c0_4 = arith.constant 0 : index
    %25 = vector.load %arg3[%c0_3, %c0_4] : memref<16x1xf32, #tpu.memory_space<vmem>>, vector<16x1xf32>
    %26 = vector.broadcast %25 : vector<16x1xf32> to vector<16x512xf32>
    %27 = arith.addf %24, %26 : vector<16x512xf32>
    %cst = arith.constant 0.000000e+00 : f32
    %28 = vector.broadcast %cst : f32 to vector<16x512xf32>
    %29 = arith.maximumf %27, %28 : vector<16x512xf32>
    %c0_5 = arith.constant 0 : index
    %c0_6 = arith.constant 0 : index
    %30 = vector.load %arg4[%c0_5, %c0_6] : memref<16x1xf32, #tpu.memory_space<vmem>>, vector<16x1xf32>
    %31 = vector.broadcast %30 : vector<16x1xf32> to vector<16x512xf32>
    %32 = arith.mulf %29, %31 : vector<16x512xf32>
    %cst_7 = arith.constant dense<0.000000e+00> : vector<512xf32>
    %33 = vector.multi_reduction <add>, %32, %cst_7 [0] : vector<16x512xf32> to vector<512xf32>
    %34 = vector.shape_cast %33 : vector<512xf32> to vector<1x512xf32>
    %c0_8 = arith.constant 0 : index
    %35 = memref.load %arg5[%c0_8] : memref<1xf32, #tpu.memory_space<smem>>
    %36 = vector.broadcast %35 : f32 to vector<1x512xf32>
    %37 = arith.addf %34, %36 : vector<1x512xf32>
    %c0_9 = arith.constant 0 : index
    %c0_10 = arith.constant 0 : index
    %38 = vector.load %arg6[%c0_9, %c0_10] : memref<1x512xf32, #tpu.memory_space<vmem>>, vector<1x512xf32>
    tpu.vector_store %arg6[%c0_9, %c0_10], %37 {strides = array<i32>} : memref<1x512xf32, #tpu.memory_space<vmem>>, vector<1x512xf32>,
    return
  }
  func.func @transform_0(%arg0: i32) -> (i32, i32) {
    %c0_i32 = arith.constant 0 : i32
    %c0_i32_0 = arith.constant 0 : i32
    return %c0_i32, %arg0 : i32, i32
  }
  func.func @transform_1(%arg0: i32) -> (i32, i32) {
    %c0_i32 = arith.constant 0 : i32
    %c0_i32_0 = arith.constant 0 : i32
    %c0_i32_1 = arith.constant 0 : i32
    return %c0_i32, %c0_i32_0 : i32, i32
  }
  func.func @transform_2(%arg0: i32) -> (i32, i32) {
    %c0_i32 = arith.constant 0 : i32
    %c0_i32_0 = arith.constant 0 : i32
    %c0_i32_1 = arith.constant 0 : i32
    return %c0_i32, %c0_i32_0 : i32, i32
  }
  func.func @transform_3(%arg0: i32) -> (i32, i32) {
    %c0_i32 = arith.constant 0 : i32
    %c0_i32_0 = arith.constant 0 : i32
    %c0_i32_1 = arith.constant 0 : i32
    return %c0_i32, %c0_i32_0 : i32, i32
  }
  func.func @transform_4(%arg0: i32) -> i32 {
    %c0_i32 = arith.constant 0 : i32
    %c0_i32_0 = arith.constant 0 : i32
    return %c0_i32 : i32
  }
  func.func @transform_5(%arg0: i32) -> (i32, i32) {
    %c0_i32 = arith.constant 0 : i32
    %c0_i32_0 = arith.constant 0 : i32
    return %c0_i32, %arg0 : i32, i32
  }
}

</mosaic_0001>

<bundles_post_ra>
// kernel: tpu_custom_call.1
= control target key start
LH: loop header
LB: loop body
LE: loop exit
PB: predicated region body
PF: predicated region fallthrough
CT: control target
= control target key end

     0   :  { %s823_s0 = inlined_call_operand.vmem [shape: f32[4,1024], index: 0, kind: input, shape index: {}]   ;;  %s824_s1 = inlined_call_operand.vmem [shape: f32[16,4], index: 1, kind: input, shape index: {}]   ;;  %s825_s2 = inlined_call_operand.vmem [shape: f32[16,1], index: 2, kind: input, shape index: {}]   ;;  %s826_s3 = inlined_call_operand.vmem [shape: f32[16,1], index: 3, kind: input, shape index: {}]   ;;  %s827_s4 = inlined_call_operand.<no memory space> [shape: f32[1], index: 4, kind: input, shape index: {}]   ;;  %s828_s5 = inlined_call_operand.hbm [shape: f32[1,1024], index: 5, kind: output, shape index: {}]  }
   0x1   :  { %10 = sst [smem:[#allocation2]] %s827_s4 }
   0x2   :  { %11 = vsyncpa [#allocation4], 0 }
   0x3   :  { %13 = vsyncpa [#allocation4 + $0x1], 0  ;;  %s710_s20 = smov 0   ;;  %s712_s21 = smov 0  }
   0x4   :  { %s714_s22 = smov 0   ;;  %s716_s23 = smov 0  }
   0x5 LB: > { %s546_s4 = sadd.s32 4294967295, %s671_s23   ;;  %s547_s24 = sadd.s32 4294967294, %s671_s23   ;;  %s671_s23 = sphi %s716_s23, %s834_s23   ;;  %s667_s22 = sphi %s714_s22, %s833_s22   ;;  %s663_s21 = sphi %s712_s21, %s832_s21   ;;  %s659_s20 = sphi %s710_s20, %s831_s20  }
   0x6   : > { %s733_s25 = sadd.s32 1, %s671_s23   ;;  %s136_s26 = sadd.s32 1, %s667_s22 }
   0x7   : > { %s133_s27 = ssub.s32 %s671_s23, %s733_s25  ;;  %p146_p0 = scmp.ne.s32.totalorder %s667_s22, %s663_s21 }
   0x8   : > { %p134_p1 = scmp.eq.s32.totalorder %s133_s27, 0  ;;  %p147_p2 = scmp.eq.s32.totalorder %s546_s4, 1 }
   0x9   : > { %p152_p3 = scmp.ne.s32.totalorder %s663_s21, %s659_s20  ;;  %p153_p4 = scmp.eq.s32.totalorder %s547_s24, 1 }
   0xa   : > { %s745_s28 = scalar_select %p134_p1, %s667_s22, %s136_s26  }
   0xb   : > { %p747_p5 = por %p147_p2, %p146_p0  ;;  %p751_p6 = por %p153_p4, %p152_p3 }
   0xc   : > { %p550_p7 = scmp.ge.s32.totalorder %s671_s23, 1  ;;  %p192_p8 = scmp.lt.s32.totalorder %s671_s23, 3 }
   0xe   : > { %p193_p9 = pnand %p550_p7, %p192_p8 }
   0xf   : > { %s777_s18 = sshll.u32 (!%p193_p9), %s546_s4, 2  ;;  %s447_s4 = sld [smem:[#allocation2]] (!%p193_p9) }
  0x10   : > { %196 = sbr.rel (%p193_p9) target bundleno = 193 (0xc1), region = 40  ;;  %p221_p10 = scmp.lt.s32.totalorder (!%p193_p9), %s777_s18, 7 }
  0x11   : > { %s217_s7 = sand.u32 (!%p193_p9), 1, %s663_s21   ;;  %s483_s11 = scalar_lea.hbm (!%p193_p9), %s828_s5, %s777_s18 }
  0x12   : > { %s787_s8 = sshll.u32 (!%p193_p9), %s217_s7, 2  ;;  %s487_s14 = sshll.u32 (!%p193_p9), %s483_s11, 4  ;;  %s488_s14 = int_to_ptr.hbm [resolvable:$true] %s487_s14 }
  0x13   : > { %s219_s12 = scalar_lea.vmem (!%p193_p9), [#allocation3], %s787_s8  ;;  %s473_s15 = scalar_lea.sflag (!%p193_p9), [#allocation4], %s217_s7 }
  0x14   : > { %s485_s13 = sshll.u32 (!%p193_p9), %s219_s12, 4  ;;  %s623_s16 = sshra.s32 (!%p193_p9), %s488_s14, 4  ;;  %s486_s13 = int_to_ptr.vmem [resolvable:$true] %s485_s13  ;;  %s624_s16 = int_to_ptr.hbm [resolvable:$true] %s623_s16 }
  0x15   : > { %v229_v0 = vld [vmem:[%s824_s1] sm:$0xff]  ;;  %v673_v1 = vmov 1   ;;  %v674_v2 = vmov 0   ;;  %v675_v3 = vmov 2   ;;  %v230_v4 = vld [vmem:[%s824_s1 + $0x8] sm:$0xff]  ;;  %v676_v5 = vmov 3   ;;  %p630_p0 = scmp.lt.s32.totalorder %s624_s16, %s828_s5 }
  0x16   : > { %602 = vset.pattern.permute.xlu1 %v673_v1  ;;  %601 = vset.pattern.permute.xlu0 %v674_v2  ;;  %v371_v6 = vld [vmem:[%s825_s2] sm:$0xff]  ;;  %v372_v7 = vld [vmem:[%s825_s2 + $0x8] sm:$0xff]  ;;  %s222_s19 = scalar_select %p221_p10, %s777_s18, 7  ;;  %vm460_vm0 = vcmask 1040384   ;;  %vm462_vm1 = vcmask 1042434   ;;  %vm464_vm2 = vcmask 1041408  }
  0x17   : > { %264 = vperm.xlu1 %602, %v229_v0   ;;  %233 = vperm.xlu0 %601, %v229_v0   ;;  %v400_v8 = vld [vmem:[%s826_s3 + $0x8] sm:$0xff]  ;;  %v399_v9 = vld [vmem:[%s826_s3] sm:$0xff]  ;;  %s625_s17 = scalar_lea.hbm %s624_s16, 4 }
  0x18   : > { %603 = vset.pattern.permute.xlu2 %v675_v3  ;;  %s553_s24 = sshll.u32 %s222_s19, 2  ;;  %p626_p11 = scmp.ne.s32.totalorder %s624_s16, %s625_s17 }
  0x19   : > { %300 = vperm.xlu2 %603, %v229_v0   ;;  %s224_s6 = scalar_lea.vmem %s823_s0, %s553_s24  ;;  %s629_s24 = scalar_lea.hbm %s828_s5, 8 }
  0x1a   : > { %v227_v10 = vld [vmem:[%s224_s6] sm:$0xff]  ;;  %v228_v11 = vld [vmem:[%s224_s6 + $0x8] sm:$0xff]  ;;  %p627_p12 = pnand %p626_p11, %p747_p5  ;;  %p631_p1 = scmp.lt.s32.totalorder %s629_s24, %s625_s17 }
  0x1b   : > { %v271_v15 = vperm.slane %v227_v10, 1  ;;  %v272_v16 = vperm.slane %v227_v10, 5  ;;  %v273_v17 = vperm.slane %v228_v11, 1  ;;  %v274_v18 = vperm.slane %v228_v11, 5 }
  0x1c   : > { %v243_v19 = vperm.slane %v227_v10, 0  ;;  %v244_v20 = vperm.slane %v227_v10, 4  ;;  %v245_v21 = vperm.slane %v228_v11, 0  ;;  %v246_v22 = vperm.slane %v228_v11, 4  ;;  %p628_p13 = pneg %p627_p12  ;;  %p632_p2 = por %p631_p1, %p630_p0 }
  0x1d   : > { %v307_v23 = vperm.slane %v227_v10, 2  ;;  %v308_v24 = vperm.slane %v227_v10, 6  ;;  %v309_v25 = vperm.slane %v228_v11, 2  ;;  %v310_v26 = vperm.slane %v228_v11, 6 }
  0x1e   : > { %v279_v27 = vperm.slane %v271_v15, 1  ;;  %v280_v28 = vperm.slane %v272_v16, 1  ;;  %v281_v29 = vperm.slane %v273_v17, 1  ;;  %v282_v30 = vperm.slane %v274_v18, 1  ;;  %p633_p3 = pnand %p632_p2, %p628_p13 }
  0x1f   : > { %268 = vperm.xlu1 %602, %v230_v4   ;;  %238 = vperm.xlu0 %601, %v230_v4   ;;  %v251_v31 = vperm.slane %v243_v19, 0  ;;  %v252_v32 = vperm.slane %v244_v20, 0  ;;  %v253_v33 = vperm.slane %v245_v21, 0  ;;  %v254_v34 = vperm.slane %v246_v22, 0 }
  0x20   : > { %v315_v35 = vperm.slane %v307_v23, 2  ;;  %v316_v36 = vperm.slane %v308_v24, 2  ;;  %v317_v37 = vperm.slane %v309_v25, 2  ;;  %v318_v38 = vperm.slane %v310_v26, 2 }
  0x21   : > { %304 = vperm.xlu2 %603, %v230_v4   ;;  %v343_v41 = vperm.slane %v227_v10, 3  ;;  %v344_v42 = vperm.slane %v227_v10, 7  ;;  %v345_v43 = vperm.slane %v228_v11, 3  ;;  %v346_v44 = vperm.slane %v228_v11, 7 }
  0x23   : > { %v351_v58 = vperm.slane %v343_v41, 3  ;;  %v352_v59 = vperm.slane %v344_v42, 3  ;;  %v353_v60 = vperm.slane %v345_v43, 3  ;;  %v354_v61 = vperm.slane %v346_v44, 3 }
  0x27   : > { %605 = vset.pattern.permute.xlu1 %v676_v5  ;;  %604 = vset.pattern.permute.xlu0 %v676_v5 }
  0x28   : > { %340 = vperm.xlu1 %605, %v230_v4   ;;  %336 = vperm.xlu0 %604, %v229_v0  }
  0x29   : > { %606 = vset.pattern.permute.xlu2 %v674_v2 }
  0x2a   : > { %375 = vperm.xlu2 %606, %v371_v6  }
  0x30   : > { %607 = vset.pattern.permute.xlu1 %v674_v2  ;;  %608 = vset.pattern.permute.xlu0 %v674_v2 }
  0x31   : > { %380 = vperm.xlu1 %607, %v372_v7   ;;  %408 = vperm.xlu0 %608, %v400_v8  }
  0x32   : > { %403 = vperm.xlu2 %606, %v399_v9  }
  0x73   : > { %v301_v12 = vpop.permute.xlu2 %300 }
  0x74   : > { %v319_v54 = vmul.f32 %v315_v35, %v301_v12  ;;  %v320_v55 = vmul.f32 %v316_v36, %v301_v12  ;;  %v321_v56 = vmul.f32 %v317_v37, %v301_v12  ;;  %v322_v57 = vmul.f32 %v318_v38, %v301_v12 }
  0x7b   : > { %v305_v53 = vpop.permute.xlu2 %304 }
  0x7c   : > { %v323_v10 = vmul.f32 %v315_v35, %v305_v53  ;;  %v324_v11 = vmul.f32 %v316_v36, %v305_v53  ;;  %v326_v12 = vmul.f32 %v318_v38, %v305_v53 }
  0x89   : > { %v265_v13 = vpop.permute.xlu1 %264  ;;  %v234_v14 = vpop.permute.xlu0 %233 }
  0x8a   : > { %v283_v45 = vmul.f32 %v279_v27, %v265_v13  ;;  %v284_v46 = vmul.f32 %v280_v28, %v265_v13  ;;  %v285_v47 = vmul.f32 %v281_v29, %v265_v13  ;;  %v286_v48 = vmul.f32 %v282_v30, %v265_v13 }
  0x8b   : > { %v255_v49 = vmul.f32 %v251_v31, %v234_v14  ;;  %v256_v50 = vmul.f32 %v252_v32, %v234_v14  ;;  %v257_v51 = vmul.f32 %v253_v33, %v234_v14  ;;  %v258_v52 = vmul.f32 %v254_v34, %v234_v14 }
  0x8c   : > { %v325_v13 = vmul.f32 %v317_v37, %v305_v53 }
  0x8d   : > { %v291_v62 = vadd.f32 %v283_v45, %v255_v49  ;;  %v292_v63 = vadd.f32 %v284_v46, %v256_v50  ;;  %v293_v0 = vadd.f32 %v285_v47, %v257_v51  ;;  %v294_v1 = vadd.f32 %v286_v48, %v258_v52 }
  0x8f   : > { %v327_v16 = vadd.f32 %v319_v54, %v291_v62  ;;  %v328_v17 = vadd.f32 %v320_v55, %v292_v63  ;;  %v329_v18 = vadd.f32 %v321_v56, %v293_v0  ;;  %v330_v19 = vadd.f32 %v322_v57, %v294_v1 }
  0x91   : > { %v269_v39 = vpop.permute.xlu1 %268  ;;  %v239_v40 = vpop.permute.xlu0 %238 }
  0x92   : > { %v287_v2 = vmul.f32 %v279_v27, %v269_v39  ;;  %v288_v3 = vmul.f32 %v280_v28, %v269_v39  ;;  %v289_v4 = vmul.f32 %v281_v29, %v269_v39  ;;  %v290_v5 = vmul.f32 %v282_v30, %v269_v39  ;;  %v376_v28 = vpop.permute.xlu2 %375 }
  0x93   : > { %v259_v6 = vmul.f32 %v251_v31, %v239_v40  ;;  %v260_v7 = vmul.f32 %v252_v32, %v239_v40  ;;  %v261_v8 = vmul.f32 %v253_v33, %v239_v40  ;;  %v262_v9 = vmul.f32 %v254_v34, %v239_v40 }
  0x95   : > { %v295_v24 = vadd.f32 %v287_v2, %v259_v6  ;;  %v296_v25 = vadd.f32 %v288_v3, %v260_v7  ;;  %v297_v26 = vadd.f32 %v289_v4, %v261_v8  ;;  %v298_v27 = vadd.f32 %v290_v5, %v262_v9 }
  0x97   : > { %v331_v41 = vadd.f32 %v323_v10, %v295_v24  ;;  %v332_v42 = vadd.f32 %v324_v11, %v296_v25  ;;  %v333_v43 = vadd.f32 %v325_v13, %v297_v26  ;;  %v334_v44 = vadd.f32 %v326_v12, %v298_v27 }
  0x9a   : > { %v341_v14 = vpop.permute.xlu1 %340  ;;  %v337_v15 = vpop.permute.xlu0 %336 }
  0x9b   : > { %v355_v20 = vmul.f32 %v351_v58, %v337_v15  ;;  %v356_v21 = vmul.f32 %v352_v59, %v337_v15  ;;  %v357_v22 = vmul.f32 %v353_v60, %v337_v15  ;;  %v358_v23 = vmul.f32 %v354_v61, %v337_v15 }
  0x9c   : > { %v359_v33 = vmul.f32 %v351_v58, %v341_v14  ;;  %v360_v34 = vmul.f32 %v352_v59, %v341_v14  ;;  %v361_v35 = vmul.f32 %v353_v60, %v341_v14  ;;  %v362_v36 = vmul.f32 %v354_v61, %v341_v14  ;;  %v404_v59 = vpop.permute.xlu2 %403 }
  0x9d   : > { %v363_v29 = vadd.f32 %v355_v20, %v327_v16  ;;  %v364_v30 = vadd.f32 %v356_v21, %v328_v17  ;;  %v365_v31 = vadd.f32 %v357_v22, %v329_v18  ;;  %v366_v32 = vadd.f32 %v358_v23, %v330_v19 }
  0x9e   : > { %v367_v46 = vadd.f32 %v359_v33, %v331_v41  ;;  %v368_v47 = vadd.f32 %v360_v34, %v332_v42  ;;  %v369_v48 = vadd.f32 %v361_v35, %v333_v43  ;;  %v370_v49 = vadd.f32 %v362_v36, %v334_v44 }
  0x9f   : > { %v383_v37 = vadd.f32 %v376_v28, %v363_v29  ;;  %v384_v38 = vadd.f32 %v376_v28, %v364_v30  ;;  %v385_v39 = vadd.f32 %v376_v28, %v365_v31  ;;  %v386_v40 = vadd.f32 %v376_v28, %v366_v32 }
  0xa0   : > { %v448_v32 = vstv %s447_s4 }
  0xa1   : > { %v391_v50 = vmax.f32 %v383_v37, 0.0  ;;  %v392_v51 = vmax.f32 %v384_v38, 0.0  ;;  %v393_v52 = vmax.f32 %v385_v39, 0.0  ;;  %v394_v53 = vmax.f32 %v386_v40, 0.0 }
  0xa2   : > { %v467_v37 = vlaneseq }
  0xa3   : > { %v381_v45 = vpop.permute.xlu1 %380  ;;  %v409_v58 = vpop.permute.xlu0 %408  ;;  %v411_v0 = vmul.f32 %v404_v59, %v391_v50  ;;  %v412_v1 = vmul.f32 %v404_v59, %v392_v51  ;;  %v413_v2 = vmul.f32 %v404_v59, %v393_v52  ;;  %v414_v3 = vmul.f32 %v404_v59, %v394_v53 }
  0xa4   : > { %v387_v54 = vadd.f32 %v381_v45, %v367_v46  ;;  %v388_v55 = vadd.f32 %v381_v45, %v368_v47  ;;  %v389_v56 = vadd.f32 %v381_v45, %v369_v48  ;;  %v390_v57 = vadd.f32 %v381_v45, %v370_v49 }
  0xa5   : > { %vm469_vm3 = vcmp.lt.s32.totalorder %v467_v37, 512 }
  0xa6   : > { %v395_v60 = vmax.f32 %v387_v54, 0.0  ;;  %v396_v61 = vmax.f32 %v388_v55, 0.0  ;;  %v397_v62 = vmax.f32 %v389_v56, 0.0  ;;  %v398_v63 = vmax.f32 %v390_v57, 0.0 }
  0xa8   : > { %v415_v4 = vmul.f32 %v409_v58, %v395_v60  ;;  %v416_v5 = vmul.f32 %v409_v58, %v396_v61  ;;  %v417_v6 = vmul.f32 %v409_v58, %v397_v62  ;;  %v418_v7 = vmul.f32 %v409_v58, %v398_v63 }
  0xaa   : > { %v419_v8 = vadd.f32 %v415_v4, %v411_v0  ;;  %v426_v9 = vadd.f32 %v416_v5, %v412_v1  ;;  %v433_v10 = vadd.f32 %v417_v6, %v413_v2  ;;  %v440_v11 = vadd.f32 %v418_v7, %v414_v3 }
  0xac   : > { %v420_v13 = vrot.slane %v419_v8, 4  ;;  %v427_v12 = vrot.slane %v426_v9, 4  ;;  %v434_v14 = vrot.slane %v433_v10, 4  ;;  %v441_v15 = vrot.slane %v440_v11, 4 }
  0xae   : > { %v421_v16 = vadd.f32 %v420_v13, %v419_v8  ;;  %v428_v17 = vadd.f32 %v427_v12, %v426_v9  ;;  %v435_v18 = vadd.f32 %v434_v14, %v433_v10  ;;  %v442_v19 = vadd.f32 %v441_v15, %v440_v11 }
  0xb0   : > { %v422_v20 = vrot.slane %v421_v16, 2  ;;  %v429_v21 = vrot.slane %v428_v17, 2  ;;  %v436_v22 = vrot.slane %v435_v18, 2  ;;  %v443_v23 = vrot.slane %v442_v19, 2 }
  0xb2   : > { %v423_v24 = vadd.f32 %v422_v20, %v421_v16  ;;  %v430_v25 = vadd.f32 %v429_v21, %v428_v17  ;;  %v437_v26 = vadd.f32 %v436_v22, %v435_v18  ;;  %v444_v27 = vadd.f32 %v443_v23, %v442_v19 }
  0xb4   : > { %v424_v28 = vrot.slane %v423_v24, 1  ;;  %v431_v29 = vrot.slane %v430_v25, 1  ;;  %v438_v30 = vrot.slane %v437_v26, 1  ;;  %v445_v31 = vrot.slane %v444_v27, 1 }
  0xb6   : > { %v425_v33 = vadd.f32 %v424_v28, %v423_v24  ;;  %v432_v34 = vadd.f32 %v431_v29, %v430_v25  ;;  %v439_v35 = vadd.f32 %v438_v30, %v437_v26  ;;  %v446_v36 = vadd.f32 %v445_v31, %v444_v27 }
  0xb8   : > { %v450_v38 = vadd.f32 %v448_v32, %v432_v34  ;;  %v451_v39 = vadd.f32 %v448_v32, %v439_v35  ;;  %v452_v40 = vadd.f32 %v448_v32, %v446_v36  ;;  %v449_v41 = vadd.f32 %v448_v32, %v425_v33 }
  0xba   : > { %v457_v42 = vrot.slane %v450_v38, 7  ;;  %v458_v43 = vrot.slane %v451_v39, 6  ;;  %v459_v44 = vrot.slane %v452_v40, 5 }
  0xbc   : > { %v461_v45 = vsel %vm460_vm0, %v449_v41, %v457_v42  ;;  %v463_v46 = vsel %vm462_vm1, %v458_v43, %v459_v44 }
  0xbd   : > { %v465_v47 = vsel %vm464_vm2, %v461_v45, %v463_v46 }
  0xbe   : > { %471 = vst.msk [vmem:[%s219_s12] sm:$0xf] %vm469_vm3, %v465_v47 }
  0xbf   : > { %636 = shalt.err (!%p633_p3)
}
  0xc0   : > { %558 = dma.vmem_to_hbm [thread:$0]  (%p747_p5), %s486_s13, 64, %s488_s14, %s473_s15  }
  0xc1 PF: > { %p564_p4 = scmp.ge.s32.totalorder %s671_s23, 2  ;;  %s499_s6 = sand.u32 1, %s659_s20  }
  0xc2   : > { %s500_s4 = scalar_lea.sflag [#allocation4], %s499_s6 }
  0xc3   : > { %p561_p7 = pnand %p564_p4, %p751_p6 }
  0xc5   : > { %p562_p8 = pneg %p561_p7 }
  0xc7   : > { %654 = dma.done.wait (%p562_p8), %s500_s4, 64  }
  0xc8   : > { %656 = vsyncadd (%p562_p8), %s500_s4, 4294967232  ;;  %p16_p9 = scmp.ge.s32.totalorder %s733_s25, 4   ;;  %s831_s20 = smov %s663_s21 }
  0xc9   : > { %s832_s21 = smov %s667_s22  ;;  %s833_s22 = smov %s745_s28 }
  0xca   : > { %s834_s23 = smov %s733_s25  ;;  %18 = sbr.rel (!%p16_p9) target bundleno = 5 (0x5), region = 75 }
  0xcf   :  { %506 = vsyncpa [#allocation4], 1 }
  0xd0   :  { %508 = vsyncpa [#allocation4 + $0x1], 1 }

</bundles_post_ra>
